<compile_context>
chip_gen: v7x
topology: tpu7x:2x2x1
jax: 0.10.0
libtpu: 0.0.40
codegen_flags: <defaults>
</compile_context>

<pallas_src>
import jax
import jax.numpy as jnp
from jax.experimental import pallas as pl
from jax.experimental.pallas import tpu as pltpu


def _round_up(x, m):
    return ((x + m - 1) // m) * m


# ---------------------------------------------------------------------------
# Kernel 1: support = x @ W   (issued once; row-tiled over nodes)
# ---------------------------------------------------------------------------
def support_kernel(x_ref, w_ref, sup_ref):
    sup_ref[...] = jnp.dot(
        x_ref[...], w_ref[...], preferred_element_type=jnp.float32
    ).astype(sup_ref.dtype)


# ---------------------------------------------------------------------------
# Kernel 2: out = relu(adj @ support), K-tiled reduction over adj columns
# ---------------------------------------------------------------------------
def aggregate_kernel(adj_ref, sup_ref, out_ref, acc_ref):
    k = pl.program_id(1)

    @pl.when(k == 0)
    def _():
        acc_ref[...] = jnp.zeros_like(acc_ref)

    acc_ref[...] += jnp.dot(
        adj_ref[...], sup_ref[...], preferred_element_type=jnp.float32
    )

    @pl.when(k == pl.num_programs(1) - 1)
    def _():
        out_ref[...] = jnp.maximum(acc_ref[...], 0.0).astype(out_ref.dtype)


def graph_convolution(x, w, adj, *, tm=256, tk=512):
    """relu(adj @ (x @ W)).  dropout p=0.0 (module default) is the identity."""
    N, fin = x.shape
    assert w.shape[0] == fin
    fout = w.shape[1]
    assert adj.shape == (N, N)
    dtype = x.dtype

    # ---- tiling / padding --------------------------------------------------
    # Lane-dense output: pad out_features up to a multiple of 128 so the second
    # matmul fills MXU columns and every store is an unmasked vst.
    fout_p = _round_up(fout, 128)
    # Row tile (sublane granularity 8) and adj-column / reduction tile (lane 128).
    tm = min(tm, _round_up(N, 8))
    tk = min(tk, _round_up(N, 128))
    nr = _round_up(N, tm)   # padded adj rows  (output rows)
    nc = _round_up(N, tk)   # padded adj cols  (== padded x rows, reduction dim)

    x_p = jnp.pad(x, ((0, nc - N), (0, 0)))
    w_p = jnp.pad(w, ((0, 0), (0, fout_p - fout)))
    adj_p = jnp.pad(adj, ((0, nr - N), (0, nc - N)))

    # ---- kernel 1: support = x @ W  (exactly once) -------------------------
    # NOTE: in_features is kept as a single block (typical GCN feature widths
    # fit VMEM comfortably); a K-axis over fin could be added the same way as
    # in kernel 2 if it ever grows very large.
    support = pl.pallas_call(
        support_kernel,
        out_shape=jax.ShapeDtypeStruct((nc, fout_p), dtype),
        grid_spec=pltpu.PrefetchScalarGridSpec(
            num_scalar_prefetch=0,
            grid=(nc // tk,),
            in_specs=[
                pl.BlockSpec((tk, fin), lambda i: (i, 0)),
                pl.BlockSpec((fin, fout_p), lambda i: (0, 0)),
            ],
            out_specs=pl.BlockSpec((tk, fout_p), lambda i: (i, 0)),
        ),
        compiler_params=pltpu.CompilerParams(
            dimension_semantics=("parallel",),
        ),
    )(x_p, w_p)

    # ---- kernel 2: out = relu(adj @ support) -------------------------------
    out_padded = pl.pallas_call(
        aggregate_kernel,
        out_shape=jax.ShapeDtypeStruct((nr, fout_p), dtype),
        grid_spec=pltpu.PrefetchScalarGridSpec(
            num_scalar_prefetch=0,
            grid=(nr // tm, nc // tk),
            in_specs=[
                pl.BlockSpec((tm, tk), lambda i, k: (i, k)),        # adj tile
                pl.BlockSpec((tk, fout_p), lambda i, k: (k, 0)),    # support tile
            ],
            out_specs=pl.BlockSpec((tm, fout_p), lambda i, k: (i, 0)),
            scratch_shapes=[pltpu.VMEM((tm, fout_p), jnp.float32)],
        ),
        compiler_params=pltpu.CompilerParams(
            dimension_semantics=("parallel", "arbitrary"),
        ),
    )(adj_p, support)

    return out_padded[:N, :fout]


def xavier_uniform(key, shape, dtype=jnp.float32):
    fan_in, fan_out = shape
    bound = jnp.sqrt(6.0 / (fan_in + fan_out))
    return jax.random.uniform(key, shape, dtype, minval=-bound, maxval=bound)


if __name__ == "__main__":
    key = jax.random.PRNGKey(0)
    k_x, k_w, k_a = jax.random.split(key, 3)

    N = 128            # number of graph nodes
    in_features = 64
    out_features = 32

    x = jax.random.normal(k_x, (N, in_features), dtype=jnp.float32)
    w = xavier_uniform(k_w, (in_features, out_features))

    # symmetric row-normalized dense adjacency (deterministic)
    a = (jax.random.uniform(k_a, (N, N)) < 0.1).astype(jnp.float32)
    a = a + a.T + jnp.eye(N, dtype=jnp.float32)
    a = jnp.clip(a, 0.0, 1.0)
    adj = a / jnp.sum(a, axis=1, keepdims=True)

    out = graph_convolution(x, w, adj)
    out = jax.block_until_ready(out)

    # reference check in plain JAX
    ref = jnp.maximum(adj @ (x @ w), 0.0)
    assert out.shape == (N, out_features)
    assert jnp.allclose(out, ref, atol=1e-5, rtol=1e-5)

    print("KERNEL_OK")
</pallas_src>

<mosaic_0001>
module attributes {stable_mosaic.version = 11 : i64} {
  func.func @support_kernel(%arg0: i32, %arg1: memref<128x64xf32, #tpu.memory_space<vmem>>, %arg2: memref<64x128xf32, #tpu.memory_space<vmem>>, %arg3: memref<128x128xf32, #tpu.memory_space<vmem>>) attributes {dimension_semantics = [#tpu.dimension_semantics<parallel>], iteration_bounds = array<i64: 1>, scalar_prefetch = 0 : i64, scratch_operands = 0 : i64, tpu.core_type = #tpu.core_type<tc>, window_params = [{transform_indices = @transform_0, window_bounds = array<i64: 128, 64>}, {pipeline_mode = #tpu.pipeline_mode<synchronous>, transform_indices = @transform_1, window_bounds = array<i64: 64, 128>}, {transform_indices = @transform_2, window_bounds = array<i64: 128, 128>}]} {
    %c0 = arith.constant 0 : index
    %c0_0 = arith.constant 0 : index
    %0 = vector.load %arg1[%c0, %c0_0] : memref<128x64xf32, #tpu.memory_space<vmem>>, vector<128x64xf32>
    %c0_1 = arith.constant 0 : index
    %c0_2 = arith.constant 0 : index
    %1 = vector.load %arg2[%c0_1, %c0_2] : memref<64x128xf32, #tpu.memory_space<vmem>>, vector<64x128xf32>
    %cst = arith.constant dense<0.000000e+00> : vector<128x128xf32>
    %2 = tpu.matmul %0, %1, %cst {dimension_numbers = #tpu.dot_dimension_numbers<[1], [0], [0], [1], [0, 0, 1, 1], [], []>} : vector<128x64xf32>, vector<64x128xf32>, vector<128x128xf32> -> vector<128x128xf32>
    %c0_3 = arith.constant 0 : index
    %c0_4 = arith.constant 0 : index
    %3 = vector.load %arg3[%c0_3, %c0_4] : memref<128x128xf32, #tpu.memory_space<vmem>>, vector<128x128xf32>
    tpu.vector_store %arg3[%c0_3, %c0_4], %2 {strides = array<i32>} : memref<128x128xf32, #tpu.memory_space<vmem>>, vector<128x128xf32>,
    return
  }
  func.func @transform_0(%arg0: i32) -> (i32, i32) {
    %c0_i32 = arith.constant 0 : i32
    %c0_i32_0 = arith.constant 0 : i32
    return %arg0, %c0_i32 : i32, i32
  }
  func.func @transform_1(%arg0: i32) -> (i32, i32) {
    %c0_i32 = arith.constant 0 : i32
    %c0_i32_0 = arith.constant 0 : i32
    %c0_i32_1 = arith.constant 0 : i32
    return %c0_i32, %c0_i32_0 : i32, i32
  }
  func.func @transform_2(%arg0: i32) -> (i32, i32) {
    %c0_i32 = arith.constant 0 : i32
    %c0_i32_0 = arith.constant 0 : i32
    return %arg0, %c0_i32 : i32, i32
  }
}

</mosaic_0001>

<bundles_post_ra>
// kernel: tpu_custom_call.1
= control target key start
LH: loop header
LB: loop body
LE: loop exit
PB: predicated region body
PF: predicated region fallthrough
CT: control target
= control target key end

     0   :  { %vm36_vm0 = vcmask 523264   ;;  %s511_s0 = inlined_call_operand.vmem [shape: f32[128,64], index: 0, kind: input, shape index: {}]   ;;  %s512_s1 = inlined_call_operand.vmem [shape: f32[64,128], index: 1, kind: input, shape index: {}]   ;;  %s513_s2 = inlined_call_operand.hbm [shape: f32[128,128], index: 2, kind: output, shape index: {}]  }
   0x1   :  { %v28_v0 = vld [vmem:[%s512_s1] sm:$0xff]  ;;  %v29_v1 = vld [vmem:[%s512_s1 + $0x8] sm:$0xff]  ;;  %v30_v2 = vld [vmem:[%s512_s1 + $0x10] sm:$0xff] }
   0x2   :  { %v342_v3 = vpack.c.bf16 %v29_v1, %v28_v0  ;;  %v31_v4 = vld [vmem:[%s512_s1 + $0x18] sm:$0xff]  ;;  %v32_v6 = vld [vmem:[%s512_s1 + $0x20] sm:$0xff]  ;;  %v33_v7 = vld [vmem:[%s512_s1 + $0x28] sm:$0xff] }
   0x3   :  { %v346_v5 = vpack.c.bf16 %v31_v4, %v30_v2  ;;  %v12_v8 = vld [vmem:[%s511_s0] sm:$0xff]  ;;  %v350_v10 = vpack.c.bf16 %v33_v7, %v32_v6  ;;  %v34_v11 = vld [vmem:[%s512_s1 + $0x30] sm:$0xff]  ;;  %v35_v12 = vld [vmem:[%s512_s1 + $0x38] sm:$0xff] }
   0x4   :  { %343 = vmatprep.subr.bf16.mxu0 %v342_v3  ;;  %358 = vmatprep.subr.bf16.mxu1 %v342_v3  ;;  %v20_v9 = vld [vmem:[%s511_s0 + $0x40] sm:$0xff] }
   0x5   :  { %345 = vmatpush3.bf16.msra.mxu0 %v342_v3  ;;  %362 = vmatpush3.bf16.msra.mxu1 %v342_v3 }
   0x6   :  { %347 = vmatprep.subr.bf16.mxu0 %v346_v5  ;;  %359 = vmatprep.subr.bf16.mxu1 %v346_v5 }
   0x7   :  { %318 = vmatprep.mubr.msk.f32.mxu0 %vm36_vm0, %v12_v8  ;;  %330 = vmatprep.mubr.msk.f32.mxu1 %vm36_vm0, %v20_v9 }
   0x9   :  { %349 = vmatpush3.bf16.msra.mxu0 %v346_v5  ;;  %363 = vmatpush3.bf16.msra.mxu1 %v346_v5 }
   0xa   :  { %7 = vsyncpa [#allocation3], 0  ;;  %351 = vmatprep.subr.bf16.mxu0 %v350_v10  ;;  %360 = vmatprep.subr.bf16.mxu1 %v350_v10  ;;  %v354_v13 = vpack.c.bf16 %v35_v12, %v34_v11  ;;  %v13_v14 = vld [vmem:[%s511_s0 + $0x8] sm:$0xff]  ;;  %v14_v16 = vld [vmem:[%s511_s0 + $0x10] sm:$0xff] }
   0xb   :  { %v21_v15 = vld [vmem:[%s511_s0 + $0x48] sm:$0xff]  ;;  %v22_v17 = vld [vmem:[%s511_s0 + $0x50] sm:$0xff]  ;;  %v15_v18 = vld [vmem:[%s511_s0 + $0x18] sm:$0xff] }
   0xc   :  { %v23_v19 = vld [vmem:[%s511_s0 + $0x58] sm:$0xff]  ;;  %v16_v20 = vld [vmem:[%s511_s0 + $0x20] sm:$0xff]  ;;  %v17_v22 = vld [vmem:[%s511_s0 + $0x28] sm:$0xff] }
   0xd   :  { %353 = vmatpush3.bf16.msra.mxu0 %v350_v10  ;;  %364 = vmatpush3.bf16.msra.mxu1 %v350_v10  ;;  %v24_v21 = vld [vmem:[%s511_s0 + $0x60] sm:$0xff]  ;;  %v25_v23 = vld [vmem:[%s511_s0 + $0x68] sm:$0xff]  ;;  %v18_v24 = vld [vmem:[%s511_s0 + $0x30] sm:$0xff] }
   0xe   :  { %355 = vmatprep.subr.bf16.mxu0 %v354_v13  ;;  %361 = vmatprep.subr.bf16.mxu1 %v354_v13  ;;  %v26_v25 = vld [vmem:[%s511_s0 + $0x70] sm:$0xff]  ;;  %v19_v26 = vld [vmem:[%s511_s0 + $0x38] sm:$0xff] }
   0xf   :  { %v27_v27 = vld [vmem:[%s511_s0 + $0x78] sm:$0xff]  ;;  %s393_s0 = smov [#allocation2]  }
  0x10   :  { %s251_s28 = sshll.u32 %s393_s0, 4  ;;  %s252_s28 = int_to_ptr.vmem [resolvable:$true] %s251_s28 }
  0x11   :  { %357 = vmatpush3.bf16.msra.mxu0 %v354_v13  ;;  %365 = vmatpush3.bf16.msra.mxu1 %v354_v13  ;;  %s369_s29 = scalar_lea.vmem %s252_s28, 2048  ;;  %p374_p1 = scmp.lt.s32.totalorder %s252_s28, %s252_s28 }
  0x12   :  { %p370_p0 = scmp.ne.s32.totalorder %s252_s28, %s369_s29  ;;  %p375_p2 = scmp.lt.s32.totalorder %s369_s29, %s369_s29 }
  0x14   :  { %319 = vmatmul.mubr.msk.f32.vlgmr.msra.gmra.mrb[0].mxu0 %vm36_vm0, %v13_v14  ;;  %331 = vmatmul.mubr.msk.f32.vlgmr.msra.gmra.mrb[0].mxu1 %vm36_vm0, %v21_v15  ;;  %p376_p3 = por %p375_p2, %p374_p1 }
  0x15   :  { %321 = vmatprep.mubr.msk.f32.mxu0 %vm36_vm0, %v14_v16  ;;  %333 = vmatprep.mubr.msk.f32.mxu1 %vm36_vm0, %v22_v17 }
  0x16   :  { %p377_p4 = pnand %p376_p3, %p370_p0 }
  0x18   :  { %322 = vmatmul.mubr.msk.f32.gmra.mrb[2].mxu0 %vm36_vm0, %v15_v18  ;;  %334 = vmatmul.mubr.msk.f32.gmra.mrb[2].mxu1 %vm36_vm0, %v23_v19 }
  0x19   :  { %324 = vmatprep.mubr.msk.f32.mxu0 %vm36_vm0, %v16_v20  ;;  %336 = vmatprep.mubr.msk.f32.mxu1 %vm36_vm0, %v24_v21 }
  0x1c   :  { %325 = vmatmul.mubr.msk.f32.gmra.mrb[4].mxu0 %vm36_vm0, %v17_v22  ;;  %337 = vmatmul.mubr.msk.f32.gmra.mrb[4].mxu1 %vm36_vm0, %v25_v23 }
  0x1d   :  { %327 = vmatprep.mubr.msk.f32.mxu0 %vm36_vm0, %v18_v24  ;;  %339 = vmatprep.mubr.msk.f32.mxu1 %vm36_vm0, %v26_v25 }
  0x20   :  { %328 = vmatmul.mubr.msk.f32.gmra.mrb[6].mxu0 %vm36_vm0, %v19_v26  ;;  %340 = vmatmul.mubr.msk.f32.gmra.mrb[6].mxu1 %vm36_vm0, %v27_v27 }
  0xe7   :  { %v320_v28 = vpop.f32.mrb[0].mxu0  ;;  %v332_v29 = vpop.f32.mrb[0].mxu1 }
  0xe8   :  { %231 = vst [vmem:[#allocation2 + $0x8] sm:$0xff] %v320_v28  ;;  %239 = vst [vmem:[#allocation2 + $0x48] sm:$0xff] %v332_v29  ;;  %v151_v30 = vpop.f32.mrb[1].mxu0  ;;  %v191_v31 = vpop.f32.mrb[1].mxu1 }
  0xe9   :  { %230 = vst [vmem:[#allocation2] sm:$0xff] %v151_v30  ;;  %238 = vst [vmem:[#allocation2 + $0x40] sm:$0xff] %v191_v31 }
  0xeb   :  { %v323_v32 = vpop.f32.mrb[2].mxu0  ;;  %v335_v33 = vpop.f32.mrb[2].mxu1 }
  0xec   :  { %233 = vst [vmem:[#allocation2 + $0x18] sm:$0xff] %v323_v32  ;;  %241 = vst [vmem:[#allocation2 + $0x58] sm:$0xff] %v335_v33  ;;  %v161_v34 = vpop.f32.mrb[3].mxu0  ;;  %v201_v35 = vpop.f32.mrb[3].mxu1 }
  0xed   :  { %232 = vst [vmem:[#allocation2 + $0x10] sm:$0xff] %v161_v34  ;;  %240 = vst [vmem:[#allocation2 + $0x50] sm:$0xff] %v201_v35 }
  0xef   :  { %v326_v36 = vpop.f32.mrb[4].mxu0  ;;  %v338_v37 = vpop.f32.mrb[4].mxu1 }
  0xf0   :  { %235 = vst [vmem:[#allocation2 + $0x28] sm:$0xff] %v326_v36  ;;  %243 = vst [vmem:[#allocation2 + $0x68] sm:$0xff] %v338_v37  ;;  %v171_v38 = vpop.f32.mrb[5].mxu0  ;;  %v211_v39 = vpop.f32.mrb[5].mxu1 }
  0xf1   :  { %234 = vst [vmem:[#allocation2 + $0x20] sm:$0xff] %v171_v38  ;;  %242 = vst [vmem:[#allocation2 + $0x60] sm:$0xff] %v211_v39 }
  0xf3   :  { %v329_v40 = vpop.f32.mrb[6].mxu0  ;;  %v341_v41 = vpop.f32.mrb[6].mxu1 }
  0xf4   :  { %237 = vst [vmem:[#allocation2 + $0x38] sm:$0xff] %v329_v40  ;;  %245 = vst [vmem:[#allocation2 + $0x78] sm:$0xff] %v341_v41  ;;  %v181_v42 = vpop.f32.mrb[7].mxu0  ;;  %v221_v43 = vpop.f32.mrb[7].mxu1 }
  0xf5   :  { %236 = vst [vmem:[#allocation2 + $0x30] sm:$0xff] %v181_v42  ;;  %244 = vst [vmem:[#allocation2 + $0x70] sm:$0xff] %v221_v43 }
  0xf6   :  { %380 = shalt.err (!%p377_p4)
}
  0xf7   :  { %s381_s3 = scalar_lea.hbm %s513_s2, 2048 }
  0xf8   :  { %p382_p5 = scmp.ne.s32.totalorder %s513_s2, %s381_s3  ;;  %p385_p6 = scmp.lt.u32.totalorder %s381_s3, %s513_s2 }
  0xfa   :  { %p387_p7 = pnand %p385_p6, %p382_p5 }
  0xfc   :  { %390 = shalt.err (!%p387_p7)
}
  0xfd   :  { %s394_s8 = smov 128   ;;  %s395_s9 = smov 8  }
  0xfe   :  { %257 = dma.vmem_to_hbm [thread:$0]  %s252_s28, 2048, %s513_s2, [#allocation3], %s394_s8, %s394_s8, %s395_s9  }
  0xff   :  { %391 = dma.done.wait [#allocation3], 2048  }
 0x100   :  { %392 = vsyncadd [#allocation3], 4294965248 }
 0x101   :  { %261 = vsyncpa [#allocation3], 1 }

</bundles_post_ra>
